<compile_context>
chip_gen: v7x
topology: tpu7x:2x2x1
jax: 0.10.0
libtpu: 0.0.40
codegen_flags: <defaults>
</compile_context>

<pallas_src>
import jax
import jax.numpy as jnp
from jax.experimental import pallas as pl
from jax.experimental.pallas import tpu as pltpu

_LANE = 128
_BF16_SUBLANE = 16          # bf16 packs 16 sublanes per vreg
_MAX_TILE_B = 4096          # keeps VMEM use small even on v7x


def _round_up(v, m):
    return ((v + m - 1) // m) * m


def _word_decoder_kernel(x_ref, w1_ref, b1_ref, w2_ref, b2_ref, w3_ref, b3_ref,
                         o_ref):
    """Fused 3-layer MLP on one batch tile.

    bf16 matmul operands, f32 accumulation, f32 bias-add/ReLU epilogue.
    Dropout = identity (inference).
    """
    x = x_ref[...].astype(jnp.bfloat16)            # cast in-kernel (no wrapper pass)

    h1 = jnp.dot(x, w1_ref[...], preferred_element_type=jnp.float32)
    h1 = jnp.maximum(h1 + b1_ref[...], 0.0)        # ReLU (Dropout = id)

    h2 = jnp.dot(h1.astype(jnp.bfloat16), w2_ref[...],
                 preferred_element_type=jnp.float32)
    h2 = jnp.maximum(h2 + b2_ref[...], 0.0)        # ReLU (Dropout = id)

    h3 = jnp.dot(h2.astype(jnp.bfloat16), w3_ref[...],
                 preferred_element_type=jnp.float32)
    o_ref[...] = (h3 + b3_ref[...]).astype(o_ref.dtype)


def init_word_decoder_params(key, N, L, num_feats):
    """Deterministic f32 parameter init matching nn.Linear shapes, stored (in, out)."""
    mid = int((L + num_feats) / 2)
    ks = jax.random.split(key, 6)

    def lin(kw, kb, fan_in, fan_out):
        # PyTorch-default-like bound: U(-1/sqrt(fan_in), 1/sqrt(fan_in))
        bound = 1.0 / jnp.sqrt(jnp.float32(fan_in))
        w = jax.random.uniform(kw, (fan_in, fan_out), jnp.float32, -bound, bound)
        b = jax.random.uniform(kb, (1, fan_out), jnp.float32, -bound, bound)
        return w, b

    w1, b1 = lin(ks[0], ks[1], N, L)
    w2, b2 = lin(ks[2], ks[3], L, mid)
    w3, b3 = lin(ks[4], ks[5], mid, num_feats)
    return {"w1": w1, "b1": b1, "w2": w2, "b2": b2, "w3": w3, "b3": b3}


def prepare_word_decoder_params(params):
    """One-time prep: zero-pad *hidden* feature dims (L, mid) to multiples of
    128 (lane-dense intermediate tiles) and cast weights to bf16.  The final
    layer's output dim (num_feats) is NOT padded -- the kernel writes the true
    output width.  Biases stay f32 (f32 epilogue)."""

    def pad_cols(a, cols):
        return jnp.pad(a, ((0, 0), (0, cols - a.shape[1])))

    def pad_rows(a, rows):
        return jnp.pad(a, ((0, rows - a.shape[0]), (0, 0)))

    L = params["w1"].shape[1]
    mid = params["w2"].shape[1]
    Lp = _round_up(L, _LANE)
    Mp = _round_up(mid, _LANE)

    return {
        "w1": pad_cols(params["w1"], Lp).astype(jnp.bfloat16),
        "b1": pad_cols(params["b1"], Lp).astype(jnp.float32),
        "w2": pad_cols(pad_rows(params["w2"], Lp), Mp).astype(jnp.bfloat16),
        "b2": pad_cols(params["b2"], Mp).astype(jnp.float32),
        "w3": pad_rows(params["w3"], Mp).astype(jnp.bfloat16),   # cols = num_feats
        "b3": params["b3"].astype(jnp.float32),                  # (1, num_feats)
    }


def word_decoder_forward(x, kparams, num_feats, *, tile_b=1024):
    """x: (B, N) float32.  kparams: output of prepare_word_decoder_params.
    Returns (B, num_feats) float32."""
    w1, b1 = kparams["w1"], kparams["b1"]
    w2, b2 = kparams["w2"], kparams["b2"]
    w3, b3 = kparams["w3"], kparams["b3"]

    B, N = x.shape
    assert w3.shape[1] == num_feats

    # Batch tile: multiple of 16 (bf16 sublane pack), large enough to amortize
    # the ~0.35us/step grid overhead, capped so VMEM stays a few MiB on v7x.
    tile_b = max(_BF16_SUBLANE,
                 min(_round_up(int(tile_b), _BF16_SUBLANE), _MAX_TILE_B))
    tile_b = min(tile_b, _round_up(B, _BF16_SUBLANE))
    # v7x has 2 TensorCores; with "parallel" semantics keep >= 2 grid steps
    # whenever B allows so neither core sits idle.
    if B > _BF16_SUBLANE and pl.cdiv(B, tile_b) < 2:
        tile_b = max(_BF16_SUBLANE, _round_up(pl.cdiv(B, 2), _BF16_SUBLANE))

    grid = (pl.cdiv(B, tile_b),)   # ragged last block handled (masked) by Pallas

    # Weights/biases: full-array blocks with a constant index_map -> fetched
    # once, VMEM-resident across all batch tiles.
    const = lambda shape: pl.BlockSpec(shape, lambda i: (0, 0))

    # Advisory cost estimate so XLA can overlap neighbors around this
    # launch-overhead-dominated kernel.
    flops = 2 * B * (w1.shape[0] * w1.shape[1]
                     + w2.shape[0] * w2.shape[1]
                     + w3.shape[0] * w3.shape[1])
    bytes_accessed = (x.size * x.dtype.itemsize
                      + B * num_feats * 4
                      + sum(int(a.size) * a.dtype.itemsize
                            for a in (w1, b1, w2, b2, w3, b3)))

    out = pl.pallas_call(
        _word_decoder_kernel,
        out_shape=jax.ShapeDtypeStruct((B, num_feats), jnp.float32),
        grid=grid,
        in_specs=[
            pl.BlockSpec((tile_b, N), lambda i: (i, 0)),   # x: tiled over batch
            const(w1.shape), const(b1.shape),
            const(w2.shape), const(b2.shape),
            const(w3.shape), const(b3.shape),
        ],
        # Output block last-dim == full array dim (num_feats): legal, and no
        # 8x-amplified padded f32 slab or trailing slice pass.
        out_specs=pl.BlockSpec((tile_b, num_feats), lambda i: (i, 0)),
        compiler_params=pltpu.CompilerParams(
            dimension_semantics=("parallel",)),            # megacore-shardable
        cost_estimate=pl.CostEstimate(flops=flops, transcendentals=0,
                                      bytes_accessed=bytes_accessed),
    )(x, w1, b1, w2, b2, w3, b3)

    return out


def _reference_forward(x, p):
    h1 = jnp.maximum(x @ p["w1"] + p["b1"], 0.0)
    h2 = jnp.maximum(h1 @ p["w2"] + p["b2"], 0.0)
    return h2 @ p["w3"] + p["b3"]


if __name__ == "__main__":
    # Small shapes consistent with the module; B deliberately not a tile
    # multiple (exercises the ragged last block) and chosen so the tile
    # clamp yields >= 2 grid steps (exercises the grid / megacore path).
    B, N, L, num_feats = 200, 32, 64, 16          # mid = (64 + 16) // 2 = 40

    key = jax.random.PRNGKey(0)
    kx, kp = jax.random.split(key)
    x = jax.random.normal(kx, (B, N), jnp.float32)

    params = init_word_decoder_params(kp, N, L, num_feats)      # f32, unpadded
    kparams = prepare_word_decoder_params(params)               # bf16, padded hidden dims

    out = word_decoder_forward(x, kparams, num_feats)
    out = jax.block_until_ready(out)

    ref = _reference_forward(x, params)
    assert out.shape == (B, num_feats)
    # bf16 matmul operands vs f32 reference -> looser tolerance (intentional
    # inference-grade accuracy trade-off).
    assert jnp.allclose(out, ref, atol=5e-2, rtol=5e-2), "mismatch vs JAX reference"

    print("KERNEL_OK")
</pallas_src>

<mosaic_0001>
module attributes {stable_mosaic.version = 11 : i64} {
  func.func @_word_decoder_kernel(%arg0: i32, %arg1: memref<112x32xf32, #tpu.memory_space<vmem>>, %arg2: memref<32x128xbf16, #tpu.memory_space<vmem>>, %arg3: memref<1x128xf32, #tpu.memory_space<vmem>>, %arg4: memref<128x128xbf16, #tpu.memory_space<vmem>>, %arg5: memref<1x128xf32, #tpu.memory_space<vmem>>, %arg6: memref<128x16xbf16, #tpu.memory_space<vmem>>, %arg7: memref<1x16xf32, #tpu.memory_space<vmem>>, %arg8: memref<112x16xf32, #tpu.memory_space<vmem>>) attributes {dimension_semantics = [#tpu.dimension_semantics<parallel>], iteration_bounds = array<i64: 2>, scalar_prefetch = 0 : i64, scratch_operands = 0 : i64, tpu.core_type = #tpu.core_type<tc>, window_params = [{transform_indices = @transform_0, window_bounds = array<i64: 112, 32>}, {pipeline_mode = #tpu.pipeline_mode<synchronous>, transform_indices = @transform_1, window_bounds = array<i64: 32, 128>}, {pipeline_mode = #tpu.pipeline_mode<synchronous>, transform_indices = @transform_2, window_bounds = array<i64: 1, 128>}, {pipeline_mode = #tpu.pipeline_mode<synchronous>, transform_indices = @transform_3, window_bounds = array<i64: 128, 128>}, {pipeline_mode = #tpu.pipeline_mode<synchronous>, transform_indices = @transform_4, window_bounds = array<i64: 1, 128>}, {pipeline_mode = #tpu.pipeline_mode<synchronous>, transform_indices = @transform_5, window_bounds = array<i64: 128, 16>}, {pipeline_mode = #tpu.pipeline_mode<synchronous>, transform_indices = @transform_6, window_bounds = array<i64: 1, 16>}, {transform_indices = @transform_7, window_bounds = array<i64: 112, 16>}]} {
    %c0 = arith.constant 0 : index
    %c0_0 = arith.constant 0 : index
    %0 = vector.load %arg1[%c0, %c0_0] : memref<112x32xf32, #tpu.memory_space<vmem>>, vector<112x32xf32>
    %1 = arith.truncf %0 : vector<112x32xf32> to vector<112x32xbf16>
    %c0_1 = arith.constant 0 : index
    %c0_2 = arith.constant 0 : index
    %2 = vector.load %arg2[%c0_1, %c0_2] : memref<32x128xbf16, #tpu.memory_space<vmem>>, vector<32x128xbf16>
    %cst = arith.constant dense<0.000000e+00> : vector<112x128xf32>
    %3 = tpu.matmul %1, %2, %cst {dimension_numbers = #tpu.dot_dimension_numbers<[1], [0], [0], [1], [0, 0, 1, 1], [], []>} : vector<112x32xbf16>, vector<32x128xbf16>, vector<112x128xf32> -> vector<112x128xf32>
    %c0_3 = arith.constant 0 : index
    %c0_4 = arith.constant 0 : index
    %4 = vector.load %arg3[%c0_3, %c0_4] : memref<1x128xf32, #tpu.memory_space<vmem>>, vector<1x128xf32>
    %5 = vector.broadcast %4 : vector<1x128xf32> to vector<112x128xf32>
    %6 = arith.addf %3, %5 : vector<112x128xf32>
    %cst_5 = arith.constant 0.000000e+00 : f32
    %7 = vector.broadcast %cst_5 : f32 to vector<112x128xf32>
    %8 = arith.maximumf %6, %7 : vector<112x128xf32>
    %9 = arith.truncf %8 : vector<112x128xf32> to vector<112x128xbf16>
    %c0_6 = arith.constant 0 : index
    %c0_7 = arith.constant 0 : index
    %10 = vector.load %arg4[%c0_6, %c0_7] : memref<128x128xbf16, #tpu.memory_space<vmem>>, vector<128x128xbf16>
    %cst_8 = arith.constant dense<0.000000e+00> : vector<112x128xf32>
    %11 = tpu.matmul %9, %10, %cst_8 {dimension_numbers = #tpu.dot_dimension_numbers<[1], [0], [0], [1], [0, 0, 1, 1], [], []>} : vector<112x128xbf16>, vector<128x128xbf16>, vector<112x128xf32> -> vector<112x128xf32>
    %c0_9 = arith.constant 0 : index
    %c0_10 = arith.constant 0 : index
    %12 = vector.load %arg5[%c0_9, %c0_10] : memref<1x128xf32, #tpu.memory_space<vmem>>, vector<1x128xf32>
    %13 = vector.broadcast %12 : vector<1x128xf32> to vector<112x128xf32>
    %14 = arith.addf %11, %13 : vector<112x128xf32>
    %cst_11 = arith.constant 0.000000e+00 : f32
    %15 = vector.broadcast %cst_11 : f32 to vector<112x128xf32>
    %16 = arith.maximumf %14, %15 : vector<112x128xf32>
    %17 = arith.truncf %16 : vector<112x128xf32> to vector<112x128xbf16>
    %c0_12 = arith.constant 0 : index
    %c0_13 = arith.constant 0 : index
    %18 = vector.load %arg6[%c0_12, %c0_13] : memref<128x16xbf16, #tpu.memory_space<vmem>>, vector<128x16xbf16>
    %cst_14 = arith.constant dense<0.000000e+00> : vector<112x16xf32>
    %19 = tpu.matmul %17, %18, %cst_14 {dimension_numbers = #tpu.dot_dimension_numbers<[1], [0], [0], [1], [0, 0, 1, 1], [], []>} : vector<112x128xbf16>, vector<128x16xbf16>, vector<112x16xf32> -> vector<112x16xf32>
    %c0_15 = arith.constant 0 : index
    %c0_16 = arith.constant 0 : index
    %20 = vector.load %arg7[%c0_15, %c0_16] : memref<1x16xf32, #tpu.memory_space<vmem>>, vector<1x16xf32>
    %21 = vector.broadcast %20 : vector<1x16xf32> to vector<112x16xf32>
    %22 = arith.addf %19, %21 : vector<112x16xf32>
    %c0_17 = arith.constant 0 : index
    %c0_18 = arith.constant 0 : index
    %23 = vector.load %arg8[%c0_17, %c0_18] : memref<112x16xf32, #tpu.memory_space<vmem>>, vector<112x16xf32>
    tpu.vector_store %arg8[%c0_17, %c0_18], %22 {strides = array<i32>} : memref<112x16xf32, #tpu.memory_space<vmem>>, vector<112x16xf32>,
    return
  }
  func.func @transform_0(%arg0: i32) -> (i32, i32) {
    %c0_i32 = arith.constant 0 : i32
    %c0_i32_0 = arith.constant 0 : i32
    return %arg0, %c0_i32 : i32, i32
  }
  func.func @transform_1(%arg0: i32) -> (i32, i32) {
    %c0_i32 = arith.constant 0 : i32
    %c0_i32_0 = arith.constant 0 : i32
    %c0_i32_1 = arith.constant 0 : i32
    return %c0_i32, %c0_i32_0 : i32, i32
  }
  func.func @transform_2(%arg0: i32) -> (i32, i32) {
    %c0_i32 = arith.constant 0 : i32
    %c0_i32_0 = arith.constant 0 : i32
    %c0_i32_1 = arith.constant 0 : i32
    return %c0_i32, %c0_i32_0 : i32, i32
  }
  func.func @transform_3(%arg0: i32) -> (i32, i32) {
    %c0_i32 = arith.constant 0 : i32
    %c0_i32_0 = arith.constant 0 : i32
    %c0_i32_1 = arith.constant 0 : i32
    return %c0_i32, %c0_i32_0 : i32, i32
  }
  func.func @transform_4(%arg0: i32) -> (i32, i32) {
    %c0_i32 = arith.constant 0 : i32
    %c0_i32_0 = arith.constant 0 : i32
    %c0_i32_1 = arith.constant 0 : i32
    return %c0_i32, %c0_i32_0 : i32, i32
  }
  func.func @transform_5(%arg0: i32) -> (i32, i32) {
    %c0_i32 = arith.constant 0 : i32
    %c0_i32_0 = arith.constant 0 : i32
    %c0_i32_1 = arith.constant 0 : i32
    return %c0_i32, %c0_i32_0 : i32, i32
  }
  func.func @transform_6(%arg0: i32) -> (i32, i32) {
    %c0_i32 = arith.constant 0 : i32
    %c0_i32_0 = arith.constant 0 : i32
    %c0_i32_1 = arith.constant 0 : i32
    return %c0_i32, %c0_i32_0 : i32, i32
  }
  func.func @transform_7(%arg0: i32) -> (i32, i32) {
    %c0_i32 = arith.constant 0 : i32
    %c0_i32_0 = arith.constant 0 : i32
    return %arg0, %c0_i32 : i32, i32
  }
}

</mosaic_0001>

<bundles_post_ra>
// kernel: tpu_custom_call.1
= control target key start
LH: loop header
LB: loop body
LE: loop exit
PB: predicated region body
PF: predicated region fallthrough
CT: control target
= control target key end

     0   :  { %s1555_s24 = smov 0   ;;  %s1557_s25 = smov 0   ;;  %s1894_s0 = inlined_call_operand.vmem [shape: f32[200,32], index: 0, kind: input, shape index: {}]   ;;  %s1895_s1 = inlined_call_operand.vmem [shape: bf16[32,128], index: 1, kind: input, shape index: {}]   ;;  %s1896_s2 = inlined_call_operand.vmem [shape: f32[1,128], index: 2, kind: input, shape index: {}]   ;;  %s1897_s3 = inlined_call_operand.vmem [shape: bf16[128,128], index: 3, kind: input, shape index: {}]   ;;  %s1898_s4 = inlined_call_operand.vmem [shape: f32[1,128], index: 4, kind: input, shape index: {}]   ;;  %s1899_s5 = inlined_call_operand.vmem [shape: bf16[128,16], index: 5, kind: input, shape index: {}]   ;;  %s1900_s6 = inlined_call_operand.vmem [shape: f32[1,16], index: 6, kind: input, shape index: {}]   ;;  %s1901_s7 = inlined_call_operand.vmem [shape: f32[200,16], index: 7, kind: output, shape index: {}]  }
   0x1   :  { %s1559_s26 = smov 0  }
   0x2 LB: > { %s1568_s27 = sadd.s32 4294967295, %s1479_s26   ;;  %s1570_s28 = sadd.s32 1, %s1479_s26   ;;  %s1479_s26 = sphi %s1559_s26, %s1908_s26   ;;  %s1475_s25 = sphi %s1557_s25, %s1907_s25   ;;  %s1471_s24 = sphi %s1555_s24, %s1906_s24  }
   0x3   : > { %s173_s29 = ssub.s32 %s1479_s26, %s1570_s28  ;;  %s176_s30 = sadd.s32 1, %s1475_s25 }
   0x4   : > { %p174_p0 = scmp.eq.s32.totalorder %s173_s29, 0  ;;  %p186_p1 = scmp.ne.s32.totalorder %s1475_s25, %s1471_s24 }
   0x5   : > { %p187_p2 = scmp.eq.s32.totalorder %s1568_s27, 1  ;;  %p1105_p3 = scmp.ge.s32.totalorder %s1479_s26, 1 }
   0x6   : > { %s1578_s8 = scalar_select %p174_p0, %s1475_s25, %s176_s30  }
   0x7   : > { %p1580_p4 = por %p187_p2, %p186_p1  ;;  %p246_p5 = scmp.lt.s32.totalorder %s1479_s26, 3 }
   0x9   : > { %p247_p6 = pnand %p1105_p3, %p246_p5 }
   0xa   : > { %v1403_v0 = vld [vmem:[%s1895_s1] sm:$0xff] (!%p247_p6)   ;;  %v1513_v1 = vmov (!%p247_p6), 0.0   ;;  %v1404_v2 = vld [vmem:[%s1895_s1 + $0x8] sm:$0xff] (!%p247_p6)   ;;  %vm1514_vm0 = vmmov (!%p247_p6), 0   ;;  %s1595_s14 = smul.u32 (!%p247_p6), 14, %s1568_s27  ;;  %vm345_vm1 = vcmask (!%p247_p6), 261120  }
   0xb   : > { %250 = sbr.rel (%p247_p6) target bundleno = 791 (0x317), region = 48  ;;  %1187 = vmatprep.subr.bf16.mxu0 (!%p247_p6), %v1513_v1  ;;  %1307 = vmatprep.subr.bf16.mxu1 (!%p247_p6), %v1513_v1  ;;  %v1405_v8 = vld [vmem:[%s1897_s3] sm:$0xff] (!%p247_p6)   ;;  %v1406_v14 = vld [vmem:[%s1897_s3 + $0x8] sm:$0xff] (!%p247_p6)   ;;  %v1407_v17 = vld [vmem:[%s1897_s3 + $0x10] sm:$0xff] (!%p247_p6)   ;;  %s278_s26 = sand.u32 (!%p247_p6), 1, %s1471_s24   ;;  %vm818_vm2 = vcmask (!%p247_p6), 130048  }
   0xc   : > { %1188 = vmatpush3.bf16.msra.mxu0 (!%p247_p6), %v1403_v0  ;;  %1191 = vmatprep.mubr.msk.bf16.mxu0 (!%p247_p6), %vm1514_vm0, %v1513_v1  ;;  %p286_p7 = scmp.lt.s32.totalorder (!%p247_p6), %s1595_s14, 24  ;;  %v1408_v23 = vld [vmem:[%s1897_s3 + $0x18] sm:$0xff] (!%p247_p6)   ;;  %v1409_v25 = vld [vmem:[%s1897_s3 + $0x20] sm:$0xff] (!%p247_p6)   ;;  %v1410_v29 = vld [vmem:[%s1897_s3 + $0x28] sm:$0xff] (!%p247_p6)   ;;  %s1311_s29 = smul.u32 (!%p247_p6), 112, %s278_s26 }
   0xd   : > { %1189 = vmatprep.subr.bf16.mxu0 (!%p247_p6), %v1513_v1  ;;  %1309 = vmatpush3.bf16.msra.mxu1 (!%p247_p6), %v1403_v0  ;;  %v1411_v30 = vld [vmem:[%s1897_s3 + $0x30] sm:$0xff] (!%p247_p6)   ;;  %v1412_v31 = vld [vmem:[%s1897_s3 + $0x38] sm:$0xff] (!%p247_p6)   ;;  %v1413_v32 = vld [vmem:[%s1899_s5] sm:$0xff] (!%p247_p6)  }
   0xe   : > { %1308 = vmatprep.subr.bf16.mxu1 (!%p247_p6), %v1513_v1  ;;  %1207 = vmatprep.mubr.msk.bf16.mxu1 (!%p247_p6), %vm1514_vm0, %v1513_v1  ;;  %v1414_v33 = vld [vmem:[%s1899_s5 + $0x8] sm:$0xff] (!%p247_p6)   ;;  %v1415_v34 = vld [vmem:[%s1899_s5 + $0x10] sm:$0xff] (!%p247_p6)   ;;  %v1416_v35 = vld [vmem:[%s1899_s5 + $0x18] sm:$0xff] (!%p247_p6)   ;;  %s1773_s11 = scalar_lea.vmem (!%p247_p6), [#allocation2], %s1311_s29  }
   0xf   : > { %v1417_v36 = vld [vmem:[%s1899_s5 + $0x20] sm:$0xff] (!%p247_p6)   ;;  %v1418_v37 = vld [vmem:[%s1899_s5 + $0x28] sm:$0xff] (!%p247_p6)  }
  0x10   : > { %1190 = vmatpush3.bf16.msra.mxu0 (!%p247_p6), %v1404_v2  ;;  %v1703_v38 = vld [vmem:[%s1896_s2] ss:$0 sm:$0xff] (!%p247_p6) }
  0x11   : > { %1310 = vmatpush3.bf16.msra.mxu1 (!%p247_p6), %v1404_v2  ;;  %1263 = vmatprep.subr.bf16.mxu0 (!%p247_p6), %v1513_v1 }
  0x12   : > { %s287_s15 = scalar_select %p286_p7, %s1595_s14, 24  ;;  %1219 = vmatprep.subr.bf16.mxu1 %v1513_v1 }
  0x13   : > { %s841_s24 = ssub.s32 (%p1580_p4), 25, %s1595_s14  ;;  %s1147_s12 = smul.u32 (%p1580_p4), 112, %s1568_s27 }
  0x14   : > { %s1106_s16 = sshll.u32 %s287_s15, 3  ;;  %p842_p8 = scmp.lt.s32.totalorder (%p1580_p4), %s841_s24, 14 }
  0x15   : > { %s1608_s19 = scalar_lea.vmem %s1894_s0, %s1106_s16  ;;  %s1810_s16 = scalar_lea.vmem (%p1580_p4), %s1901_s7, %s1147_s12  }
  0x16   : > { %v301_v3 = vld [vmem:[%s1608_s19] sm:$0xff]  ;;  %v302_v4 = vld [vmem:[%s1608_s19 + $0x8] sm:$0xff]  ;;  %v303_v9 = vld [vmem:[%s1608_s19 + $0x10] sm:$0xff] }
  0x17   : > { %v315_v5 = vpack.c.bf16 %v302_v4, %v301_v3  ;;  %v309_v6 = vld [vmem:[%s1608_s19 + $0x40] sm:$0xff]  ;;  %v310_v7 = vld [vmem:[%s1608_s19 + $0x48] sm:$0xff]  ;;  %v304_v10 = vld [vmem:[%s1608_s19 + $0x18] sm:$0xff] }
  0x18   : > { %v319_v11 = vpack.c.bf16 %v310_v7, %v309_v6  ;;  %v311_v12 = vld [vmem:[%s1608_s19 + $0x50] sm:$0xff]  ;;  %v312_v13 = vld [vmem:[%s1608_s19 + $0x58] sm:$0xff]  ;;  %v316_v15 = vpack.c.bf16 %v304_v10, %v303_v9  ;;  %v305_v18 = vld [vmem:[%s1608_s19 + $0x20] sm:$0xff] }
  0x19   : > { %1192 = vmatmul.mubr.msk.bf16.vlgmr.msra.gmra.mrb[0].mxu0 %vm345_vm1, %v315_v5  ;;  %v320_v16 = vpack.c.bf16 %v312_v13, %v311_v12  ;;  %v306_v19 = vld [vmem:[%s1608_s19 + $0x28] sm:$0xff]  ;;  %v313_v21 = vld [vmem:[%s1608_s19 + $0x60] sm:$0xff]  ;;  %v307_v26 = vld [vmem:[%s1608_s19 + $0x30] sm:$0xff] }
  0x1a   : > { %1195 = vmatprep.mubr.msk.bf16.mxu0 %vm1514_vm0, %v1513_v1  ;;  %1208 = vmatmul.mubr.msk.bf16.vlgmr.msra.gmra.mrb[0].mxu1 %vm345_vm1, %v319_v11  ;;  %v317_v20 = vpack.c.bf16 %v306_v19, %v305_v18  ;;  %v314_v22 = vld [vmem:[%s1608_s19 + $0x68] sm:$0xff]  ;;  %v308_v27 = vld [vmem:[%s1608_s19 + $0x38] sm:$0xff] }
  0x1b   : > { %1211 = vmatprep.mubr.msk.bf16.mxu1 %vm1514_vm0, %v1513_v1  ;;  %1220 = vmatpush3.bf16.msra.mxu1 %v1405_v8  ;;  %v321_v24 = vpack.c.bf16 %v314_v22, %v313_v21  ;;  %v318_v28 = vpack.c.bf16 %v308_v27, %v307_v26 }
  0x1c   : > { %1221 = vmatprep.subr.bf16.mxu1 %v1513_v1  ;;  %1264 = vmatpush3.bf16.msra.mxu0 %v1413_v32 }
  0x1d   : > { %1265 = vmatprep.subr.bf16.mxu0 %v1513_v1 }
  0x1f   : > { %1222 = vmatpush3.bf16.msra.mxu1 %v1406_v14 }
  0x20   : > { %1223 = vmatprep.subr.bf16.mxu1 %v1513_v1  ;;  %1266 = vmatpush3.bf16.msra.mxu0 %v1414_v33 }
  0x21   : > { %1196 = vmatmul.mubr.msk.bf16.gmra.mrb[4].mxu0 %vm345_vm1, %v316_v15  ;;  %1267 = vmatprep.subr.bf16.mxu0 %v1513_v1 }
  0x22   : > { %1199 = vmatprep.mubr.msk.bf16.mxu0 %vm1514_vm0, %v1513_v1  ;;  %1212 = vmatmul.mubr.msk.bf16.gmra.mrb[4].mxu1 %vm345_vm1, %v320_v16 }
  0x23   : > { %1215 = vmatprep.mubr.msk.bf16.mxu1 %vm1514_vm0, %v1513_v1  ;;  %1224 = vmatpush3.bf16.msra.mxu1 %v1407_v17 }
  0x24   : > { %1225 = vmatprep.subr.bf16.mxu1 %v1513_v1  ;;  %1268 = vmatpush3.bf16.msra.mxu0 %v1415_v34 }
  0x25   : > { %1269 = vmatprep.subr.bf16.mxu0 %v1513_v1 }
  0x27   : > { %1226 = vmatpush3.bf16.msra.mxu1 %v1408_v23 }
  0x28   : > { %1227 = vmatprep.subr.bf16.mxu1 %v1513_v1  ;;  %1270 = vmatpush3.bf16.msra.mxu0 %v1416_v35 }
  0x29   : > { %1200 = vmatmul.mubr.msk.bf16.gmra.mrb[8].mxu0 %vm345_vm1, %v317_v20  ;;  %1271 = vmatprep.subr.bf16.mxu0 %v1513_v1 }
  0x2a   : > { %1203 = vmatprep.mubr.msk.bf16.mxu0 %vm1514_vm0, %v1513_v1  ;;  %1216 = vmatmul.mubr.msk.bf16.gmra.mrb[8].mxu1 %vm345_vm1, %v321_v24 }
  0x2b   : > { %1228 = vmatpush3.bf16.msra.mxu1 %v1409_v25  ;;  %1235 = vmatprep.mubr.msk.bf16.mxu1 %vm1514_vm0, %v1513_v1 }
  0x2c   : > { %1229 = vmatprep.subr.bf16.mxu1 %v1513_v1  ;;  %1272 = vmatpush3.bf16.msra.mxu0 %v1417_v36 }
  0x2d   : > { %1273 = vmatprep.subr.bf16.mxu0 %v1513_v1 }
  0x2f   : > { %1230 = vmatpush3.bf16.msra.mxu1 %v1410_v29 }
  0x30   : > { %1231 = vmatprep.subr.bf16.mxu1 %v1513_v1  ;;  %1274 = vmatpush3.bf16.msra.mxu0 %v1418_v37 }
  0x31   : > { %1204 = vmatmul.mubr.msk.bf16.gmra.mrb[12].mxu0 %vm345_vm1, %v318_v28  ;;  %1275 = vmatprep.subr.bf16.mxu0 %v1513_v1 }
  0x32   : > { %1279 = vmatprep.mubr.msk.bf16.mxu0 %vm1514_vm0, %v1513_v1 }
  0x33   : > { %1232 = vmatpush3.bf16.msra.mxu1 %v1411_v30 }
  0x34   : > { %1233 = vmatprep.subr.bf16.mxu1 %v1513_v1 }
  0x37   : > { %1234 = vmatpush3.bf16.msra.mxu1 %v1412_v31 }
  0xec   : > { %v401_v39 = vpop.f32.mrb[0].mxu0 }
  0xed   : > { %v402_v40 = vadd.f32 %v1703_v38, %v401_v39  ;;  %v1193_v41 = vpop.f32.mrb[1].mxu0  ;;  %v433_v45 = vpop.f32.mrb[0].mxu1 }
  0xee   : > { %v404_v42 = vpop.f32.mrb[2].mxu0  ;;  %v434_v46 = vadd.f32 %v1703_v38, %v433_v45  ;;  %v1209_v47 = vpop.f32.mrb[1].mxu1  ;;  %v1741_v41 = vld [vmem:[%s1898_s4] ss:$0 sm:$0xff] }
  0xef   : > { %v405_v43 = vadd.f32 %v1703_v38, %v404_v42  ;;  %v1194_v44 = vpop.f32.mrb[3].mxu0  ;;  %v456_v48 = vmax.f32 %v402_v40, 0.0  ;;  %v436_v50 = vpop.f32.mrb[2].mxu1  ;;  %v1420_v40 = vld [vmem:[%s1899_s5 + $0x38] sm:$0xff]  }
  0xf0   : > { %v464_v51 = vmax.f32 %v434_v46, 0.0  ;;  %v437_v52 = vadd.f32 %v1703_v38, %v436_v50  ;;  %v1210_v53 = vpop.f32.mrb[3].mxu1 }
  0xf1   : > { %v457_v49 = vmax.f32 %v405_v43, 0.0 }
  0xf2   : > { %v465_v56 = vmax.f32 %v437_v52, 0.0 }
  0xf3   : > { %v470_v54 = vpack.c.bf16 %v457_v49, %v456_v48 }
  0xf4   : > { %v409_v55 = vpop.f32.mrb[4].mxu0  ;;  %v474_v60 = vpack.c.bf16 %v465_v56, %v464_v51 }
  0xf5   : > { %v410_v57 = vadd.f32 %v1703_v38, %v409_v55  ;;  %v1197_v58 = vpop.f32.mrb[5].mxu0  ;;  %1236 = vmatmul.mubr.bf16.vlgmr.msra.gmra.mrb[12].mxu1 %v470_v54  ;;  %v441_v63 = vpop.f32.mrb[4].mxu1 }
  0xf6   : > { %v412_v59 = vpop.f32.mrb[6].mxu0  ;;  %1239 = vmatprep.mubr.msk.bf16.mxu1 %vm1514_vm0, %v1513_v1  ;;  %v442_v0 = vadd.f32 %v1703_v38, %v441_v63  ;;  %v1213_v2 = vpop.f32.mrb[5].mxu1 }
  0xf7   : > { %v413_v61 = vadd.f32 %v1703_v38, %v412_v59  ;;  %v1198_v62 = vpop.f32.mrb[7].mxu0  ;;  %v458_v3 = vmax.f32 %v410_v57, 0.0  ;;  %v444_v5 = vpop.f32.mrb[6].mxu1 }
  0xf8   : > { %v466_v6 = vmax.f32 %v442_v0, 0.0  ;;  %v445_v7 = vadd.f32 %v1703_v38, %v444_v5  ;;  %v1214_v8 = vpop.f32.mrb[7].mxu1 }
  0xf9   : > { %v459_v4 = vmax.f32 %v413_v61, 0.0 }
  0xfa   : > { %v467_v11 = vmax.f32 %v445_v7, 0.0 }
  0xfb   : > { %v471_v9 = vpack.c.bf16 %v459_v4, %v458_v3 }
  0xfc   : > { %v417_v10 = vpop.f32.mrb[8].mxu0  ;;  %v475_v15 = vpack.c.bf16 %v467_v11, %v466_v6 }
  0xfd   : > { %v418_v12 = vadd.f32 %v1703_v38, %v417_v10  ;;  %v1201_v13 = vpop.f32.mrb[9].mxu0  ;;  %1240 = vmatmul.mubr.bf16.gmra.mrb[16].mxu1 %v471_v9  ;;  %v449_v18 = vpop.f32.mrb[8].mxu1 }
  0xfe   : > { %v420_v14 = vpop.f32.mrb[10].mxu0  ;;  %1243 = vmatprep.mubr.msk.bf16.mxu1 %vm1514_vm0, %v1513_v1  ;;  %v450_v19 = vadd.f32 %v1703_v38, %v449_v18  ;;  %v1217_v20 = vpop.f32.mrb[9].mxu1 }
  0xff   : > { %v421_v16 = vadd.f32 %v1703_v38, %v420_v14  ;;  %v1202_v17 = vpop.f32.mrb[11].mxu0  ;;  %v460_v21 = vmax.f32 %v418_v12, 0.0  ;;  %v452_v23 = vpop.f32.mrb[10].mxu1 }
 0x100   : > { %v468_v24 = vmax.f32 %v450_v19, 0.0  ;;  %v453_v25 = vadd.f32 %v1703_v38, %v452_v23  ;;  %v1218_v26 = vpop.f32.mrb[11].mxu1 }
 0x101   : > { %v461_v22 = vmax.f32 %v421_v16, 0.0 }
 0x102   : > { %v469_v29 = vmax.f32 %v453_v25, 0.0 }
 0x103   : > { %v472_v27 = vpack.c.bf16 %v461_v22, %v460_v21 }
 0x104   : > { %v425_v28 = vpop.f32.mrb[12].mxu0  ;;  %v476_v33 = vpack.c.bf16 %v469_v29, %v468_v24 }
 0x105   : > { %v426_v30 = vadd.f32 %v1703_v38, %v425_v28  ;;  %v1205_v31 = vpop.f32.mrb[13].mxu0  ;;  %1244 = vmatmul.mubr.bf16.gmra.mrb[20].mxu1 %v472_v27 }
 0x106   : > { %v428_v32 = vpop.f32.mrb[14].mxu0  ;;  %1247 = vmatprep.mubr.msk.bf16.mxu1 %vm1514_vm0, %v1513_v1 }
 0x107   : > { %v429_v34 = vadd.f32 %v1703_v38, %v428_v32  ;;  %v1206_v35 = vpop.f32.mrb[15].mxu0  ;;  %v462_v36 = vmax.f32 %v426_v30, 0.0  ;;  %v1419_v38 = vld [vmem:[%s1899_s5 + $0x30] sm:$0xff]  }
 0x108   : > { %1276 = vmatpush3.bf16.msra.mxu0 %v1419_v38 }
 0x109   : > { %v463_v37 = vmax.f32 %v429_v34, 0.0  ;;  %1277 = vmatprep.subr.bf16.mxu0 %v1513_v1 }
 0x10b   : > { %v473_v39 = vpack.c.bf16 %v463_v37, %v462_v36 }
 0x10c   : > { %1278 = vmatpush3.bf16.msra.mxu0 %v1420_v40 }
 0x10d   : > { %1248 = vmatmul.mubr.bf16.gmra.mrb[24].mxu1 %v473_v39 }
 0x10e   : > { %1251 = vmatprep.mubr.msk.bf16.mxu1 %vm1514_vm0, %v1513_v1 }
 0x115   : > { %1252 = vmatmul.mubr.bf16.gmra.mrb[28].mxu1 %v474_v60 }
 0x116   : > { %1255 = vmatprep.mubr.msk.bf16.mxu1 %vm1514_vm0, %v1513_v1 }
 0x11d   : > { %1256 = vmatmul.mubr.bf16.gmra.mrb[32].mxu1 %v475_v15 }
 0x11e   : > { %1259 = vmatprep.mubr.msk.bf16.mxu1 %vm1514_vm0, %v1513_v1 }
 0x125   : > { %1260 = vmatmul.mubr.bf16.gmra.mrb[36].mxu1 %v476_v33 }
 0x1c8   : > { %v582_v42 = vpop.f32.mrb[12].mxu1 }
 0x1c9   : > { %v583_v43 = vadd.f32 %v1741_v41, %v582_v42  ;;  %v1237_v44 = vpop.f32.mrb[13].mxu1 }
 0x1ca   : > { %v585_v45 = vpop.f32.mrb[14].mxu1 }
 0x1cb   : > { %v586_v46 = vadd.f32 %v1741_v41, %v585_v45  ;;  %v1238_v47 = vpop.f32.mrb[15].mxu1  ;;  %v637_v48 = vmax.f32 %v583_v43, 0.0  ;;  %v1126_v43 = vld [vmem:[%s1900_s6] ss:$0 sm:$0xff] }
 0x1cd   : > { %v638_v49 = vmax.f32 %v586_v46, 0.0 }
 0x1cf   : > { %v651_v50 = vpack.c.bf16 %v638_v49, %v637_v48 }
 0x1d0   : > { %v590_v51 = vpop.f32.mrb[16].mxu1 }
 0x1d1   : > { %v591_v52 = vadd.f32 %v1741_v41, %v590_v51  ;;  %v1241_v53 = vpop.f32.mrb[17].mxu1  ;;  %1280 = vmatmul.mubr.bf16.vlgmr.msra.gmra.mrb[16].mxu0 %v651_v50 }
 0x1d2   : > { %v593_v54 = vpop.f32.mrb[18].mxu1  ;;  %1283 = vmatprep.mubr.msk.bf16.mxu0 %vm1514_vm0, %v1513_v1 }
 0x1d3   : > { %v594_v55 = vadd.f32 %v1741_v41, %v593_v54  ;;  %v1242_v56 = vpop.f32.mrb[19].mxu1  ;;  %v639_v57 = vmax.f32 %v591_v52, 0.0 }
 0x1d5   : > { %v640_v58 = vmax.f32 %v594_v55, 0.0 }
 0x1d7   : > { %v652_v59 = vpack.c.bf16 %v640_v58, %v639_v57 }
 0x1d8   : > { %v598_v60 = vpop.f32.mrb[20].mxu1 }
 0x1d9   : > { %v599_v61 = vadd.f32 %v1741_v41, %v598_v60  ;;  %v1245_v62 = vpop.f32.mrb[21].mxu1  ;;  %1284 = vmatmul.mubr.bf16.gmra.mrb[20].mxu0 %v652_v59 }
 0x1da   : > { %v601_v63 = vpop.f32.mrb[22].mxu1  ;;  %1287 = vmatprep.mubr.msk.bf16.mxu0 %vm1514_vm0, %v1513_v1 }
 0x1db   : > { %v602_v0 = vadd.f32 %v1741_v41, %v601_v63  ;;  %v1246_v2 = vpop.f32.mrb[23].mxu1  ;;  %v641_v3 = vmax.f32 %v599_v61, 0.0 }
 0x1dd   : > { %v642_v4 = vmax.f32 %v602_v0, 0.0 }
 0x1df   : > { %v653_v5 = vpack.c.bf16 %v642_v4, %v641_v3 }
 0x1e0   : > { %v606_v6 = vpop.f32.mrb[24].mxu1 }
 0x1e1   : > { %v607_v7 = vadd.f32 %v1741_v41, %v606_v6  ;;  %v1249_v8 = vpop.f32.mrb[25].mxu1  ;;  %1288 = vmatmul.mubr.bf16.gmra.mrb[24].mxu0 %v653_v5 }
 0x1e2   : > { %v609_v9 = vpop.f32.mrb[26].mxu1  ;;  %1291 = vmatprep.mubr.msk.bf16.mxu0 %vm1514_vm0, %v1513_v1 }
 0x1e3   : > { %v610_v10 = vadd.f32 %v1741_v41, %v609_v9  ;;  %v1250_v11 = vpop.f32.mrb[27].mxu1  ;;  %v643_v12 = vmax.f32 %v607_v7, 0.0 }
 0x1e5   : > { %v644_v13 = vmax.f32 %v610_v10, 0.0 }
 0x1e7   : > { %v654_v14 = vpack.c.bf16 %v644_v13, %v643_v12 }
 0x1e8   : > { %v614_v15 = vpop.f32.mrb[28].mxu1 }
 0x1e9   : > { %v615_v16 = vadd.f32 %v1741_v41, %v614_v15  ;;  %v1253_v17 = vpop.f32.mrb[29].mxu1  ;;  %1292 = vmatmul.mubr.bf16.gmra.mrb[28].mxu0 %v654_v14 }
 0x1ea   : > { %v617_v18 = vpop.f32.mrb[30].mxu1  ;;  %1295 = vmatprep.mubr.msk.bf16.mxu0 %vm1514_vm0, %v1513_v1 }
 0x1eb   : > { %v618_v19 = vadd.f32 %v1741_v41, %v617_v18  ;;  %v1254_v20 = vpop.f32.mrb[31].mxu1  ;;  %v645_v21 = vmax.f32 %v615_v16, 0.0 }
 0x1ed   : > { %v646_v22 = vmax.f32 %v618_v19, 0.0 }
 0x1ef   : > { %v655_v23 = vpack.c.bf16 %v646_v22, %v645_v21 }
 0x1f0   : > { %v622_v24 = vpop.f32.mrb[32].mxu1 }
 0x1f1   : > { %v623_v25 = vadd.f32 %v1741_v41, %v622_v24  ;;  %v1257_v26 = vpop.f32.mrb[33].mxu1  ;;  %1296 = vmatmul.mubr.bf16.gmra.mrb[32].mxu0 %v655_v23 }
 0x1f2   : > { %v625_v27 = vpop.f32.mrb[34].mxu1  ;;  %1299 = vmatprep.mubr.msk.bf16.mxu0 %vm1514_vm0, %v1513_v1 }
 0x1f3   : > { %v626_v28 = vadd.f32 %v1741_v41, %v625_v27  ;;  %v1258_v29 = vpop.f32.mrb[35].mxu1  ;;  %v647_v30 = vmax.f32 %v623_v25, 0.0 }
 0x1f5   : > { %v648_v31 = vmax.f32 %v626_v28, 0.0 }
 0x1f7   : > { %v656_v32 = vpack.c.bf16 %v648_v31, %v647_v30 }
 0x1f8   : > { %v630_v33 = vpop.f32.mrb[36].mxu1 }
 0x1f9   : > { %v631_v34 = vadd.f32 %v1741_v41, %v630_v33  ;;  %v1261_v35 = vpop.f32.mrb[37].mxu1  ;;  %1300 = vmatmul.mubr.bf16.gmra.mrb[36].mxu0 %v656_v32 }
 0x1fa   : > { %v633_v36 = vpop.f32.mrb[38].mxu1  ;;  %1303 = vmatprep.mubr.msk.bf16.mxu0 %vm1514_vm0, %v1513_v1 }
 0x1fb   : > { %v634_v37 = vadd.f32 %v1741_v41, %v633_v36  ;;  %v1262_v39 = vpop.f32.mrb[39].mxu1  ;;  %v649_v38 = vmax.f32 %v631_v34, 0.0 }
 0x1fd   : > { %v650_v40 = vmax.f32 %v634_v37, 0.0 }
 0x1ff   : > { %v657_v42 = vpack.c.bf16 %v650_v40, %v649_v38 }
 0x201   : > { %1304 = vmatmul.mubr.bf16.gmra.mrb[40].mxu0 %v657_v42 }
 0x2a4   : > { %v763_v44 = vpop.f32.mrb[16].mxu0 }
 0x2a5   : > { %v764_v45 = vadd.f32 %v1126_v43, %v763_v44  ;;  %v1281_v46 = vpop.f32.mrb[17].mxu0 }
 0x2a6   : > { %v766_v47 = vpop.f32.mrb[18].mxu0 }
 0x2a7   : > { %819 = vst.msk [vmem:[%s1773_s11] sm:$0xff] %vm818_vm2, %v764_v45  ;;  %v767_v1 = vadd.f32 %v1126_v43, %v766_v47  ;;  %v1282_v41 = vpop.f32.mrb[19].mxu0 }
 0x2a9   : > { %820 = vst.msk [vmem:[%s1773_s11 + $0x8] sm:$0xff] %vm818_vm2, %v767_v1 }
 0x2ac   : > { %v771_v48 = vpop.f32.mrb[20].mxu0 }
 0x2ad   : > { %v772_v49 = vadd.f32 %v1126_v43, %v771_v48  ;;  %v1285_v50 = vpop.f32.mrb[21].mxu0 }
 0x2ae   : > { %v774_v51 = vpop.f32.mrb[22].mxu0 }
 0x2af   : > { %821 = vst.msk [vmem:[%s1773_s11 + $0x10] sm:$0xff] %vm818_vm2, %v772_v49  ;;  %v775_v52 = vadd.f32 %v1126_v43, %v774_v51  ;;  %v1286_v53 = vpop.f32.mrb[23].mxu0 }
 0x2b1   : > { %822 = vst.msk [vmem:[%s1773_s11 + $0x18] sm:$0xff] %vm818_vm2, %v775_v52 }
 0x2b4   : > { %v779_v54 = vpop.f32.mrb[24].mxu0 }
 0x2b5   : > { %v780_v55 = vadd.f32 %v1126_v43, %v779_v54  ;;  %v1289_v56 = vpop.f32.mrb[25].mxu0 }
 0x2b6   : > { %v782_v57 = vpop.f32.mrb[26].mxu0 }
 0x2b7   : > { %823 = vst.msk [vmem:[%s1773_s11 + $0x20] sm:$0xff] %vm818_vm2, %v780_v55  ;;  %v783_v58 = vadd.f32 %v1126_v43, %v782_v57  ;;  %v1290_v59 = vpop.f32.mrb[27].mxu0 }
 0x2b9   : > { %824 = vst.msk [vmem:[%s1773_s11 + $0x28] sm:$0xff] %vm818_vm2, %v783_v58 }
 0x2bc   : > { %v787_v60 = vpop.f32.mrb[28].mxu0 }
 0x2bd   : > { %v788_v61 = vadd.f32 %v1126_v43, %v787_v60  ;;  %v1293_v62 = vpop.f32.mrb[29].mxu0 }
 0x2be   : > { %v790_v63 = vpop.f32.mrb[30].mxu0 }
 0x2bf   : > { %825 = vst.msk [vmem:[%s1773_s11 + $0x30] sm:$0xff] %vm818_vm2, %v788_v61  ;;  %v791_v0 = vadd.f32 %v1126_v43, %v790_v63  ;;  %v1294_v2 = vpop.f32.mrb[31].mxu0 }
 0x2c1   : > { %826 = vst.msk [vmem:[%s1773_s11 + $0x38] sm:$0xff] %vm818_vm2, %v791_v0 }
 0x2c4   : > { %v795_v3 = vpop.f32.mrb[32].mxu0 }
 0x2c5   : > { %v796_v4 = vadd.f32 %v1126_v43, %v795_v3  ;;  %v1297_v5 = vpop.f32.mrb[33].mxu0 }
 0x2c6   : > { %v798_v6 = vpop.f32.mrb[34].mxu0 }
 0x2c7   : > { %827 = vst.msk [vmem:[%s1773_s11 + $0x40] sm:$0xff] %vm818_vm2, %v796_v4  ;;  %v799_v7 = vadd.f32 %v1126_v43, %v798_v6  ;;  %v1298_v8 = vpop.f32.mrb[35].mxu0 }
 0x2c9   : > { %828 = vst.msk [vmem:[%s1773_s11 + $0x48] sm:$0xff] %vm818_vm2, %v799_v7 }
 0x2cc   : > { %v803_v9 = vpop.f32.mrb[36].mxu0 }
 0x2cd   : > { %v804_v10 = vadd.f32 %v1126_v43, %v803_v9  ;;  %v1301_v11 = vpop.f32.mrb[37].mxu0 }
 0x2ce   : > { %v806_v12 = vpop.f32.mrb[38].mxu0 }
 0x2cf   : > { %829 = vst.msk [vmem:[%s1773_s11 + $0x50] sm:$0xff] %vm818_vm2, %v804_v10  ;;  %v807_v13 = vadd.f32 %v1126_v43, %v806_v12  ;;  %v1302_v14 = vpop.f32.mrb[39].mxu0 }
 0x2d1   : > { %830 = vst.msk [vmem:[%s1773_s11 + $0x58] sm:$0xff] %vm818_vm2, %v807_v13 }
 0x2d3   : > { %839 = sbr.rel (!%p1580_p4) target bundleno = 791 (0x317), region = 52 }
 0x2d4   : > { %v811_v15 = vpop.f32.mrb[40].mxu0 }
 0x2d5   : > { %v812_v16 = vadd.f32 %v1126_v43, %v811_v15  ;;  %v1305_v17 = vpop.f32.mrb[41].mxu0 }
 0x2d6   : > { %v814_v18 = vpop.f32.mrb[42].mxu0 }
 0x2d7   : > { %831 = vst.msk [vmem:[%s1773_s11 + $0x60] sm:$0xff] %vm818_vm2, %v812_v16  ;;  %v815_v19 = vadd.f32 %v1126_v43, %v814_v18  ;;  %v1306_v20 = vpop.f32.mrb[43].mxu0 }
 0x2d9   : > { %832 = vst.msk [vmem:[%s1773_s11 + $0x68] sm:$0xff] %vm818_vm2, %v815_v19 }
 0x2da   : > { %s1910_s24 = smov (!%p842_p8, %s841_s24), 14 }
 0x2db   : > { %s1135_s17 = sshll.u32 %s1910_s24, 7 }
 0x2dc   : > { %p1138_p9 = scmp.eq.s32.totalorder %s1135_s17, 0 }
 0x2dd   : > { %1421 = sdivrem.u32 (!%p1138_p9), %s1910_s24, 14 }
 0x2de   : > { %850 = sbr.rel (%p1138_p9) target bundleno = 791 (0x317), region = 56 }
 0x2e6   : > { %s1816_s9 = spop.drf %1421 }
 0x2e7   : > { %p1139_p10 = scmp.le.s32.totalorder %s1816_s9, 0 }
 0x2e8   : > { %s1903_s27 = smov (!%p1139_p10), %s1810_s16  ;;  %s1904_s14 = smov (!%p1139_p10), %s1773_s11 }
 0x2e9   : > { %1058 = sbr.rel (%p1139_p10) target bundleno = 762 (0x2fa), region = 132  ;;  %s1825_s18 = smov (!%p1139_p10), 0  }
 0x2ea   : > { %s1827_s19 = smov (!%p1139_p10), 0  }
 0x2f0 LB: >> { %v940_v21 = vld [vmem:[%s1487_s14] sm:$0xff]  ;;  %v942_v22 = vld [vmem:[%s1487_s14 + $0x8] sm:$0xff]  ;;  %v944_v23 = vld [vmem:[%s1487_s14 + $0x10] sm:$0xff]  ;;  %s968_s20 = sadd.s32 1, %s1491_s18  ;;  %s934_s19 = sadd.s32 1, %s1495_s19   ;;  %s1495_s19 = sphi %s1827_s19, %s934_s19   ;;  %s1491_s18 = sphi %s1825_s18, %s1905_s18   ;;  %s1487_s14 = sphi %s1904_s14, %s973_s14   ;;  %s1483_s27 = sphi %s1903_s27, %s974_s27  }
 0x2f1   : >> { %941 = vst [vmem:[%s1483_s27] sm:$0xff] %v940_v21  ;;  %943 = vst [vmem:[%s1483_s27 + $0x8] sm:$0xff] %v942_v22  ;;  %v946_v24 = vld [vmem:[%s1487_s14 + $0x18] sm:$0xff]  ;;  %v948_v25 = vld [vmem:[%s1487_s14 + $0x20] sm:$0xff]  ;;  %p969_p11 = scmp.ge.s32.totalorder %s968_s20, %s1816_s9  ;;  %p933_p12 = scmp.ge.s32.totalorder %s934_s19, %s1816_s9 }
 0x2f2   : >> { %945 = vst [vmem:[%s1483_s27 + $0x10] sm:$0xff] %v944_v23  ;;  %v950_v26 = vld [vmem:[%s1487_s14 + $0x28] sm:$0xff]  ;;  %947 = vst [vmem:[%s1483_s27 + $0x18] sm:$0xff] %v946_v24  ;;  %v952_v27 = vld [vmem:[%s1487_s14 + $0x30] sm:$0xff] }
 0x2f3   : >> { %949 = vst [vmem:[%s1483_s27 + $0x20] sm:$0xff] %v948_v25  ;;  %951 = vst [vmem:[%s1483_s27 + $0x28] sm:$0xff] %v950_v26  ;;  %v954_v28 = vld [vmem:[%s1487_s14 + $0x38] sm:$0xff]  ;;  %v956_v29 = vld [vmem:[%s1487_s14 + $0x40] sm:$0xff]  ;;  %s1912_s20 = smov (%p969_p11, %s968_s20), 0  ;;  %936 = sbr.rel (!%p933_p12) target bundleno = 752 (0x2f0), region = 138 }
 0x2f4   : >> { %953 = vst [vmem:[%s1483_s27 + $0x30] sm:$0xff] %v952_v27  ;;  %955 = vst [vmem:[%s1483_s27 + $0x38] sm:$0xff] %v954_v28  ;;  %v958_v30 = vld [vmem:[%s1487_s14 + $0x48] sm:$0xff]  ;;  %v960_v31 = vld [vmem:[%s1487_s14 + $0x50] sm:$0xff]  ;;  %s971_s21 = smul.u32 112, %s1912_s20  ;;  %s1905_s18 = smov %s1912_s20 }
 0x2f5   : >> { %957 = vst [vmem:[%s1483_s27 + $0x40] sm:$0xff] %v956_v29  ;;  %v962_v32 = vld [vmem:[%s1487_s14 + $0x58] sm:$0xff]  ;;  %959 = vst [vmem:[%s1483_s27 + $0x48] sm:$0xff] %v958_v30  ;;  %v964_v33 = vld [vmem:[%s1487_s14 + $0x60] sm:$0xff] }
 0x2f6   : >> { %961 = vst [vmem:[%s1483_s27 + $0x50] sm:$0xff] %v960_v31  ;;  %963 = vst [vmem:[%s1483_s27 + $0x58] sm:$0xff] %v962_v32  ;;  %v966_v34 = vld [vmem:[%s1487_s14 + $0x68] sm:$0xff]  ;;  %s973_s14 = scalar_lea.vmem %s1773_s11, %s971_s21 [#allocation2]  }
 0x2f7   : >> { %965 = vst [vmem:[%s1483_s27 + $0x60] sm:$0xff] %v964_v33  ;;  %967 = vst [vmem:[%s1483_s27 + $0x68] sm:$0xff] %v966_v34  ;;  %s974_s27 = scalar_lea.vmem %s1810_s16, %s971_s21  }
 0x2fa PF: > { %1423 = sdivrem.u32 %s1910_s24, 14 }
 0x2fb   : > { %s1140_s22 = smul.u32 112, %s1816_s9 }
 0x2fd   : > { %s979_s23 = scalar_lea.vmem %s1773_s11, %s1140_s22 [#allocation2]   ;;  %s981_s26 = scalar_lea.vmem %s1810_s16, %s1140_s22  }
 0x303   : > { %s1424_s29 = spop.drf %1423 }
 0x304   : > { %p1142_p13 = scmp.le.s32.totalorder %s1424_s29, 0 }
 0x305   : > { %s1497_s30 = smov (!%p1142_p13), %s981_s26   ;;  %s1501_s10 = smov (!%p1142_p13), %s979_s23  }
 0x306   : > { %1072 = sbr.rel (%p1142_p13) target bundleno = 791 (0x317), region = 143  ;;  %s1505_s12 = smov (!%p1142_p13), 0  }
 0x307   : > { %s1509_s13 = smov (!%p1142_p13), 0  }
 0x30d LB: >> { %v991_v35 = vld [vmem:[%s1503_s10] sm:$0xff]  ;;  %s993_s15 = sadd.s32 1, %s1507_s12  ;;  %s985_s13 = sadd.s32 1, %s1511_s13   ;;  %s1511_s13 = sphi %s1509_s13, %s985_s13   ;;  %s1507_s12 = sphi %s1505_s12, %s1506_s12   ;;  %s1503_s10 = sphi %s1501_s10, %s998_s10   ;;  %s1499_s30 = sphi %s1497_s30, %s999_s30  }
 0x30e   : >> { %992 = vst [vmem:[%s1499_s30] sm:$0xff] %v991_v35  ;;  %p994_p0 = scmp.ge.s32.totalorder %s993_s15, %s1424_s29  ;;  %p984_p1 = scmp.ge.s32.totalorder %s985_s13, %s1424_s29 }
 0x310   : >> { %s1914_s15 = smov (%p994_p0, %s993_s15), 0  ;;  %987 = sbr.rel (!%p984_p1) target bundleno = 781 (0x30d), region = 149 }
 0x311   : >> { %s1143_s11 = sshll.u32 %s1914_s15, 3  ;;  %s1506_s12 = smov %s1914_s15  }
 0x312   : >> { %s998_s10 = scalar_lea.vmem %s979_s23, %s1143_s11 [#allocation2]   ;;  %s999_s30 = scalar_lea.vmem %s981_s26, %s1143_s11  }
 0x317 PF: > { %p14_p2 = scmp.ge.s32.totalorder %s1570_s28, 4   ;;  %s1906_s24 = smov %s1475_s25 }
 0x318   : > { %s1907_s25 = smov %s1578_s8  ;;  %s1908_s26 = smov %s1570_s28 }
 0x319   :  { %16 = sbr.rel (!%p14_p2) target bundleno = 2 (0x2), region = 160 }

</bundles_post_ra>
